<compile_context>
chip_gen: v5e
topology: v5e:2x2
jax: 0.10.0
libtpu: 0.0.40
codegen_flags: <defaults>
</compile_context>

<pallas_src>
import functools

import jax
import jax.numpy as jnp
from jax.experimental import pallas as pl
from jax.experimental.pallas import tpu as pltpu


def user_encoder_kernel(x_ref, w1_ref, b1_ref, w2_ref, o_ref, *,
                        n_valid, mxu_dtype):
    # x_ref: (BT, Np, H)   w1_ref: (H, A)   b1_ref: (1, A)   w2_ref: (1, A)
    # o_ref: (BT, H)       n_valid: true (unpadded) N, static Python int
    BT, Np, H = x_ref.shape
    A = w1_ref.shape[1]
    x = x_ref[...]                                   # native dtype (f32/bf16)

    # Attention MLP: one flattened, MXU-shaped matmul per grid step.
    # (BT*Np, H) @ (H, A); Np % 8 == 0 (wrapper pads) so the reshape is free.
    xf = x.reshape(BT * Np, H)
    h = jnp.tanh(
        jnp.dot(xf.astype(mxu_dtype), w1_ref[...].astype(mxu_dtype),
                preferred_element_type=jnp.float32)
        + b1_ref[...].astype(jnp.float32)
    ).reshape(BT, Np, A)                             # (BT, Np, A), f32

    # Linear(A -> 1): broadcast multiply + lane reduce.  The Linear(64->1)
    # bias is intentionally dropped: softmax over N is shift-invariant.
    scores = jnp.sum(h * w2_ref[...].astype(jnp.float32),
                     axis=-1, keepdims=True)         # (BT, Np, 1), f32

    if n_valid < Np:
        # Padded news rows must not contribute to the softmax denominator.
        idx = jax.lax.broadcasted_iota(jnp.int32, (BT, Np, 1), 1)
        scores = jnp.where(idx < n_valid, scores, -jnp.inf)

    # Numerically-safe softmax over the news axis.
    m = jnp.max(scores, axis=1, keepdims=True)       # (BT, 1, 1)
    e = jnp.exp(scores - m)                          # (BT, Np, 1); padded -> 0
    s = jnp.sum(e, axis=1, keepdims=True)            # (BT, 1, 1)

    # Weighted sum in the input dtype, f32 accumulate; normalize the reduced
    # (BT, H) accumulator (not the (BT, Np, 1) weights); reciprocal -> EUP.
    acc = jnp.sum(x * e.astype(x.dtype), axis=1, dtype=jnp.float32)  # (BT, H)
    acc = acc * pl.reciprocal(s[:, 0, :], approx=True)               # (BT, H)
    o_ref[...] = acc.astype(o_ref.dtype)


def _choose_block_b(B, Np, H, itemsize, target_block_bytes=4 << 20):
    """Samples per grid step, sized by bytes (kernel is HBM-bandwidth bound).

    Target ~4 MiB per (block_b, Np, H) input block (measured: >=1 MiB blocks
    reach ~85% of HBM roofline on v6e vs ~60% at 128 KiB), block_b a multiple
    of 8 when tiling so the (block_b, H) output block is sublane-dense.
    Double-buffered 4 MiB blocks + f32 intermediates stay well inside the
    48 MiB vmem_limit_bytes set below (v7x-safe).
    """
    if B <= 8:
        return B                                   # single full-batch step
    row_bytes = Np * H * itemsize
    bb = max(1, target_block_bytes // row_bytes)
    if bb >= B:
        return B                                   # one full-batch step
    return min(B, max(8, (bb // 8) * 8))


def user_encoder(news_embeddings, w1, b1, w2, *, block_b=None,
                 mxu_dtype=jnp.bfloat16):
    """Pallas UserEncoder forward.

    news_embeddings: (B, N, H)
    w1: (H, A)            = nn.Linear(H, 64).weight.T
    b1: (A,) or (1, A)    = nn.Linear(H, 64).bias
    w2: (A,) or (1, A)    = nn.Linear(64, 1).weight
    nn.Linear(64, 1).bias is not needed: it shifts every score equally and
    softmax over the news axis is shift-invariant.
    """
    B, N, H = news_embeddings.shape
    A = w1.shape[1]
    b1 = jnp.asarray(b1).reshape(1, A)
    w2 = jnp.asarray(w2).reshape(1, A)

    # Pad the news axis to a multiple of 8 so the in-kernel reshape is
    # tile-aligned; padded scores are masked to -inf inside the kernel.
    Np = max(8, ((N + 7) // 8) * 8)

    itemsize = jnp.dtype(news_embeddings.dtype).itemsize
    if block_b is None:
        block_b = _choose_block_b(B, Np, H, itemsize)
    block_b = int(block_b)
    if block_b >= B:
        block_b = B                                       # one full-batch step
    elif block_b % 8 != 0:
        block_b = min(B, max(8, (block_b // 8) * 8))      # sublane-aligned

    n_steps = pl.cdiv(B, block_b)
    Bp = n_steps * block_b

    x = news_embeddings
    if Bp != B or Np != N:
        # Zero B-padding rows: uniform softmax over zero embeddings -> zero
        # output, sliced away below.  N-padding is masked to -inf in-kernel.
        x = jnp.pad(x, ((0, Bp - B), (0, Np - N), (0, 0)))

    kernel = functools.partial(user_encoder_kernel, n_valid=N,
                               mxu_dtype=mxu_dtype)

    out = pl.pallas_call(
        kernel,
        out_shape=jax.ShapeDtypeStruct((Bp, H), news_embeddings.dtype),
        grid_spec=pltpu.PrefetchScalarGridSpec(
            num_scalar_prefetch=0,
            grid=(n_steps,),
            in_specs=[
                pl.BlockSpec((block_b, Np, H), lambda i: (i, 0, 0)),
                pl.BlockSpec((H, A), lambda i: (0, 0)),   # weights: constant
                pl.BlockSpec((1, A), lambda i: (0, 0)),   #   index maps ->
                pl.BlockSpec((1, A), lambda i: (0, 0)),   #   VMEM-resident
            ],
            out_specs=pl.BlockSpec((block_b, H), lambda i: (i, 0)),
        ),
        compiler_params=pltpu.CompilerParams(
            dimension_semantics=("parallel",),
            # Raise v5e/v6e scoped defaults (16/32 MiB), stay under v7x's
            # 64 MiB physical VMEM.
            vmem_limit_bytes=48 << 20,
        ),
    )(x, w1, b1, w2)
    return out[:B]


def user_encoder_ref(x, w1, b1, w2, b2):
    """Pure-JAX reference, including the (mathematically no-op) b2."""
    h = jnp.tanh(x @ w1 + jnp.reshape(b1, (1, 1, -1)))                  # (B, N, A)
    scores = h @ jnp.reshape(w2, (-1, 1)) + jnp.reshape(b2, (1, 1, 1))  # (B, N, 1)
    attn = jax.nn.softmax(scores, axis=1)
    return jnp.sum(x * attn, axis=1)                                    # (B, H)


if __name__ == "__main__":
    # Module default hidden_dim = 128 (lane-dense output); small B and N.
    B, N, H, A = 16, 8, 128, 64

    key = jax.random.PRNGKey(0)
    kx, kw1, kb1, kw2, kb2 = jax.random.split(key, 5)

    x = jax.random.normal(kx, (B, N, H), dtype=jnp.float32)
    w1 = jax.random.normal(kw1, (H, A), dtype=jnp.float32) * 0.1   # Linear(H,64).weight.T
    b1 = jax.random.normal(kb1, (1, A), dtype=jnp.float32) * 0.1
    w2 = jax.random.normal(kw2, (1, A), dtype=jnp.float32) * 0.1   # Linear(64,1).weight
    b2 = jax.random.normal(kb2, (1, 1), dtype=jnp.float32) * 0.1   # no-op under softmax

    ref = user_encoder_ref(x, w1, b1, w2, b2)   # ref keeps b2 -> shows shift-invariance

    # Main path (bf16 MXU operands, approx reciprocal): byte-budgeted block_b
    # covers the whole batch in one grid step here.
    out = jax.block_until_ready(user_encoder(x, w1, b1, w2))
    assert out.shape == (B, H)
    assert jnp.allclose(out, ref, atol=1e-2, rtol=1e-2), \
        float(jnp.max(jnp.abs(out - ref)))

    # Full-precision MXU path: tight tolerance vs the f32 reference.
    out_f32 = jax.block_until_ready(
        user_encoder(x, w1, b1, w2, mxu_dtype=jnp.float32))
    assert jnp.allclose(out_f32, ref, atol=2e-3, rtol=2e-3), \
        float(jnp.max(jnp.abs(out_f32 - ref)))

    # Small-batch (B <= 8) single-step path.
    out_small = jax.block_until_ready(user_encoder(x[:5], w1, b1, w2))
    assert jnp.allclose(out_small, ref[:5], atol=1e-2, rtol=1e-2)

    # Batch-tiling + padding path: B=11 with forced block_b=8 -> padded to 16.
    out_odd = jax.block_until_ready(user_encoder(x[:11], w1, b1, w2, block_b=8))
    assert jnp.allclose(out_odd, ref[:11], atol=1e-2, rtol=1e-2)

    # News-axis padding + -inf mask path: N=6 padded to 8 inside the wrapper.
    x6 = x[:, :6, :]
    ref6 = user_encoder_ref(x6, w1, b1, w2, b2)
    out6 = jax.block_until_ready(user_encoder(x6, w1, b1, w2))
    assert jnp.allclose(out6, ref6, atol=1e-2, rtol=1e-2)

    print("KERNEL_OK")
</pallas_src>

<mosaic_0001>
module attributes {stable_mosaic.version = 11 : i64} {
  func.func @user_encoder_kernel(%arg0: i32, %arg1: memref<16x8x128xf32, #tpu.memory_space<vmem>>, %arg2: memref<128x64xf32, #tpu.memory_space<vmem>>, %arg3: memref<1x64xf32, #tpu.memory_space<vmem>>, %arg4: memref<1x64xf32, #tpu.memory_space<vmem>>, %arg5: memref<16x128xf32, #tpu.memory_space<vmem>>) attributes {dimension_semantics = [#tpu.dimension_semantics<parallel>], iteration_bounds = array<i64: 1>, scalar_prefetch = 0 : i64, scratch_operands = 0 : i64, tpu.core_type = #tpu.core_type<tc>, window_params = [{transform_indices = @transform_0, window_bounds = array<i64: 16, 8, 128>}, {pipeline_mode = #tpu.pipeline_mode<synchronous>, transform_indices = @transform_1, window_bounds = array<i64: 128, 64>}, {pipeline_mode = #tpu.pipeline_mode<synchronous>, transform_indices = @transform_2, window_bounds = array<i64: 1, 64>}, {pipeline_mode = #tpu.pipeline_mode<synchronous>, transform_indices = @transform_3, window_bounds = array<i64: 1, 64>}, {transform_indices = @transform_4, window_bounds = array<i64: 16, 128>}]} {
    %c0 = arith.constant 0 : index
    %c0_0 = arith.constant 0 : index
    %c0_1 = arith.constant 0 : index
    %0 = vector.load %arg1[%c0, %c0_0, %c0_1] : memref<16x8x128xf32, #tpu.memory_space<vmem>>, vector<16x8x128xf32>
    %1 = vector.shape_cast %0 : vector<16x8x128xf32> to vector<128x128xf32>
    %2 = arith.truncf %1 : vector<128x128xf32> to vector<128x128xbf16>
    %c0_2 = arith.constant 0 : index
    %c0_3 = arith.constant 0 : index
    %3 = vector.load %arg2[%c0_2, %c0_3] : memref<128x64xf32, #tpu.memory_space<vmem>>, vector<128x64xf32>
    %4 = arith.truncf %3 : vector<128x64xf32> to vector<128x64xbf16>
    %cst = arith.constant dense<0.000000e+00> : vector<128x64xf32>
    %5 = tpu.matmul %2, %4, %cst {dimension_numbers = #tpu.dot_dimension_numbers<[1], [0], [0], [1], [0, 0, 1, 1], [], []>} : vector<128x128xbf16>, vector<128x64xbf16>, vector<128x64xf32> -> vector<128x64xf32>
    %c0_4 = arith.constant 0 : index
    %c0_5 = arith.constant 0 : index
    %6 = vector.load %arg3[%c0_4, %c0_5] : memref<1x64xf32, #tpu.memory_space<vmem>>, vector<1x64xf32>
    %7 = vector.broadcast %6 : vector<1x64xf32> to vector<128x64xf32>
    %8 = arith.addf %5, %7 : vector<128x64xf32>
    %9 = math.tanh %8 : vector<128x64xf32>
    %10 = vector.shape_cast %9 : vector<128x64xf32> to vector<16x8x64xf32>
    %c0_6 = arith.constant 0 : index
    %c0_7 = arith.constant 0 : index
    %11 = vector.load %arg4[%c0_6, %c0_7] : memref<1x64xf32, #tpu.memory_space<vmem>>, vector<1x64xf32>
    %12 = vector.shape_cast %11 : vector<1x64xf32> to vector<1x1x64xf32>
    %13 = vector.broadcast %12 : vector<1x1x64xf32> to vector<16x8x64xf32>
    %14 = arith.mulf %10, %13 : vector<16x8x64xf32>
    %cst_8 = arith.constant dense<0.000000e+00> : vector<16x8xf32>
    %15 = vector.multi_reduction <add>, %14, %cst_8 [2] : vector<16x8x64xf32> to vector<16x8xf32>
    %16 = vector.shape_cast %15 : vector<16x8xf32> to vector<16x8x1xf32>
    %cst_9 = arith.constant dense<0xFF800000> : vector<16x1xf32>
    %17 = vector.multi_reduction <maximumf>, %16, %cst_9 [1] : vector<16x8x1xf32> to vector<16x1xf32>
    %18 = vector.shape_cast %17 : vector<16x1xf32> to vector<16x1x1xf32>
    %19 = vector.broadcast %18 : vector<16x1x1xf32> to vector<16x8x1xf32>
    %20 = arith.subf %16, %19 : vector<16x8x1xf32>
    %21 = math.exp %20 : vector<16x8x1xf32>
    %cst_10 = arith.constant dense<0.000000e+00> : vector<16x1xf32>
    %22 = vector.multi_reduction <add>, %21, %cst_10 [1] : vector<16x8x1xf32> to vector<16x1xf32>
    %23 = vector.shape_cast %22 : vector<16x1xf32> to vector<16x1x1xf32>
    %24 = vector.broadcast %21 : vector<16x8x1xf32> to vector<16x8x128xf32>
    %25 = arith.mulf %0, %24 : vector<16x8x128xf32>
    %cst_11 = arith.constant dense<0.000000e+00> : vector<16x128xf32>
    %26 = vector.multi_reduction <add>, %25, %cst_11 [1] : vector<16x8x128xf32> to vector<16x128xf32>
    %27 = vector.shape_cast %23 : vector<16x1x1xf32> to vector<16x1xf32>
    %28 = tpu.reciprocal %27 {approx = true} : vector<16x1xf32> -> vector<16x1xf32>
    %29 = vector.broadcast %28 : vector<16x1xf32> to vector<16x128xf32>
    %30 = arith.mulf %26, %29 : vector<16x128xf32>
    %c0_12 = arith.constant 0 : index
    %c0_13 = arith.constant 0 : index
    %31 = vector.load %arg5[%c0_12, %c0_13] : memref<16x128xf32, #tpu.memory_space<vmem>>, vector<16x128xf32>
    tpu.vector_store %arg5[%c0_12, %c0_13], %30 {strides = array<i32>} : memref<16x128xf32, #tpu.memory_space<vmem>>, vector<16x128xf32>,
    return
  }
  func.func @transform_0(%arg0: i32) -> (i32, i32, i32) {
    %c0_i32 = arith.constant 0 : i32
    %c0_i32_0 = arith.constant 0 : i32
    %c0_i32_1 = arith.constant 0 : i32
    return %arg0, %c0_i32, %c0_i32_0 : i32, i32, i32
  }
  func.func @transform_1(%arg0: i32) -> (i32, i32) {
    %c0_i32 = arith.constant 0 : i32
    %c0_i32_0 = arith.constant 0 : i32
    %c0_i32_1 = arith.constant 0 : i32
    return %c0_i32, %c0_i32_0 : i32, i32
  }
  func.func @transform_2(%arg0: i32) -> (i32, i32) {
    %c0_i32 = arith.constant 0 : i32
    %c0_i32_0 = arith.constant 0 : i32
    %c0_i32_1 = arith.constant 0 : i32
    return %c0_i32, %c0_i32_0 : i32, i32
  }
  func.func @transform_3(%arg0: i32) -> (i32, i32) {
    %c0_i32 = arith.constant 0 : i32
    %c0_i32_0 = arith.constant 0 : i32
    %c0_i32_1 = arith.constant 0 : i32
    return %c0_i32, %c0_i32_0 : i32, i32
  }
  func.func @transform_4(%arg0: i32) -> (i32, i32) {
    %c0_i32 = arith.constant 0 : i32
    %c0_i32_0 = arith.constant 0 : i32
    return %arg0, %c0_i32 : i32, i32
  }
}

</mosaic_0001>

<bundles_post_ra>
// kernel: tpu_custom_call.1
= control target key start
LH: loop header
LB: loop body
LE: loop exit
PB: predicated region body
PF: predicated region fallthrough
CT: control target
= control target key end

     0   :  { %s1178_s0 = inlined_call_operand.vmem [shape: f32[16,8,128], index: 0, kind: input, shape index: {}]   ;;  %s1179_s1 = inlined_call_operand.vmem [shape: f32[128,64], index: 1, kind: input, shape index: {}]   ;;  %s1180_s2 = inlined_call_operand.vmem [shape: f32[1,64], index: 2, kind: input, shape index: {}]   ;;  %s1181_s3 = inlined_call_operand.vmem [shape: f32[1,64], index: 3, kind: input, shape index: {}]   ;;  %s1182_s4 = inlined_call_operand.hbm [shape: f32[16,128], index: 4, kind: output, shape index: {}]  }
   0x1   :  { %v56_v0 = vld [vmem:[%s1179_s1 + $0x70] sm:$0xff]  ;;  %v57_v1 = vld [vmem:[%s1179_s1 + $0x78] sm:$0xff]  ;;  %v54_v2 = vld [vmem:[%s1179_s1 + $0x60] sm:$0xff] }
   0x2   :  { %v65_v3 = vpack.c.bf16 %v57_v1, %v56_v0  ;;  %v55_v4 = vld [vmem:[%s1179_s1 + $0x68] sm:$0xff]  ;;  %v52_v6 = vld [vmem:[%s1179_s1 + $0x50] sm:$0xff]  ;;  %v53_v7 = vld [vmem:[%s1179_s1 + $0x58] sm:$0xff] }
   0x3   :  { %v64_v5 = vpack.c.bf16 %v55_v4, %v54_v2  ;;  %v63_v8 = vpack.c.bf16 %v53_v7, %v52_v6  ;;  %v50_v9 = vld [vmem:[%s1179_s1 + $0x40] sm:$0xff]  ;;  %v51_v10 = vld [vmem:[%s1179_s1 + $0x48] sm:$0xff] }
   0x4   :  { %70 = vmatpush.bf16.msra.mxu0 %v65_v3  ;;  %647 = vmatpush.bf16.msra.mxu1 %v65_v3 }
   0x5   :  { %648 = vmatpush.bf16.msra.mxu2 %v65_v3  ;;  %649 = vmatpush.bf16.msra.mxu3 %v65_v3 }
   0x8   :  { %71 = vmatpush.bf16.msra.mxu0 %v64_v5  ;;  %650 = vmatpush.bf16.msra.mxu1 %v64_v5 }
   0x9   :  { %651 = vmatpush.bf16.msra.mxu2 %v64_v5  ;;  %652 = vmatpush.bf16.msra.mxu3 %v64_v5 }
   0xa   :  { %9 = vsyncpa [#allocation3], 0  ;;  %v62_v11 = vpack.c.bf16 %v51_v10, %v50_v9  ;;  %v48_v12 = vld [vmem:[%s1179_s1 + $0x30] sm:$0xff]  ;;  %v49_v13 = vld [vmem:[%s1179_s1 + $0x38] sm:$0xff]  ;;  %vm155_vm0 = vcmask 523264   ;;  %vm604_vm1 = vcmask 1041409  }
   0xb   :  { %v61_v14 = vpack.c.bf16 %v49_v13, %v48_v12  ;;  %v46_v15 = vld [vmem:[%s1179_s1 + $0x20] sm:$0xff]  ;;  %v47_v16 = vld [vmem:[%s1179_s1 + $0x28] sm:$0xff]  ;;  %v44_v18 = vld [vmem:[%s1179_s1 + $0x10] sm:$0xff]  ;;  %vm606_vm2 = vcmask 1042434   ;;  %vm608_vm3 = vcmask 1043459   ;;  %vm610_vm4 = vcmask 1044484  }
   0xc   :  { %72 = vmatpush.bf16.msra.mxu0 %v63_v8  ;;  %653 = vmatpush.bf16.msra.mxu1 %v63_v8  ;;  %v60_v17 = vpack.c.bf16 %v47_v16, %v46_v15  ;;  %v45_v19 = vld [vmem:[%s1179_s1 + $0x18] sm:$0xff]  ;;  %v42_v21 = vld [vmem:[%s1179_s1] sm:$0xff]  ;;  %v43_v22 = vld [vmem:[%s1179_s1 + $0x8] sm:$0xff]  ;;  %vm612_vm5 = vcmask 1045509   ;;  %vm614_vm6 = vcmask 1046534   ;;  %vm616_vm7 = vcmask 1047559  }
   0xd   :  { %654 = vmatpush.bf16.msra.mxu2 %v63_v8  ;;  %655 = vmatpush.bf16.msra.mxu3 %v63_v8  ;;  %v59_v20 = vpack.c.bf16 %v45_v19, %v44_v18  ;;  %v878_v23 = vld [vmem:[%s1178_s0] sm:$0xff]  ;;  %v883_v24 = vld [vmem:[%s1178_s0 + $0x8] sm:$0xff]  ;;  %v58_v25 = vpack.c.bf16 %v43_v22, %v42_v21  ;;  %v926_v36 = vld [vmem:[%s1178_s0 + $0x10] sm:$0xff]  ;;  %s635_s6 = sshll.u32 %s1182_s4, 4  ;;  %s800_s7 = smov 128   ;;  %s636_s6 = int_to_ptr.hbm [resolvable:$true] %s635_s6 }
   0xe   :  { %v888_v26 = vld [vmem:[%s1178_s0 + $0x20] sm:$0xff]  ;;  %v893_v27 = vld [vmem:[%s1178_s0 + $0x28] sm:$0xff]  ;;  %v34_v32 = vpack.c.bf16 %v883_v24, %v878_v23  ;;  %v931_v37 = vld [vmem:[%s1178_s0 + $0x18] sm:$0xff]  ;;  %s801_s8 = smov 8  }
   0xf   :  { %v898_v28 = vld [vmem:[%s1178_s0 + $0x40] sm:$0xff]  ;;  %v903_v29 = vld [vmem:[%s1178_s0 + $0x48] sm:$0xff]  ;;  %v36_v33 = vpack.c.bf16 %v893_v27, %v888_v26  ;;  %v936_v38 = vld [vmem:[%s1178_s0 + $0x30] sm:$0xff]  ;;  %v35_v44 = vpack.c.bf16 %v931_v37, %v926_v36 }
  0x10   :  { %73 = vmatpush.bf16.msra.mxu0 %v62_v11  ;;  %656 = vmatpush.bf16.msra.mxu1 %v62_v11  ;;  %v908_v30 = vld [vmem:[%s1178_s0 + $0x60] sm:$0xff]  ;;  %v913_v31 = vld [vmem:[%s1178_s0 + $0x68] sm:$0xff]  ;;  %v38_v34 = vpack.c.bf16 %v903_v29, %v898_v28  ;;  %v941_v39 = vld [vmem:[%s1178_s0 + $0x38] sm:$0xff] }
  0x11   :  { %657 = vmatpush.bf16.msra.mxu2 %v62_v11  ;;  %658 = vmatpush.bf16.msra.mxu3 %v62_v11  ;;  %v40_v35 = vpack.c.bf16 %v913_v31, %v908_v30  ;;  %v946_v40 = vld [vmem:[%s1178_s0 + $0x50] sm:$0xff]  ;;  %v951_v41 = vld [vmem:[%s1178_s0 + $0x58] sm:$0xff]  ;;  %v37_v45 = vpack.c.bf16 %v941_v39, %v936_v38  ;;  %v971_v48 = vld [vmem:[%s1180_s2] ss:$0 sm:$0xff] }
  0x12   :  { %v956_v42 = vld [vmem:[%s1178_s0 + $0x70] sm:$0xff]  ;;  %v33_v43 = vld [vmem:[%s1178_s0 + $0x78] sm:$0xff]  ;;  %v39_v46 = vpack.c.bf16 %v951_v41, %v946_v40  ;;  %v978_v53 = vld [vmem:[%s1181_s3] ss:$0 sm:$0xff] }
  0x13   :  { %v41_v47 = vpack.c.bf16 %v33_v43, %v956_v42 }
  0x14   :  { %74 = vmatpush.bf16.msra.mxu0 %v61_v14  ;;  %659 = vmatpush.bf16.msra.mxu1 %v61_v14 }
  0x15   :  { %660 = vmatpush.bf16.msra.mxu2 %v61_v14  ;;  %661 = vmatpush.bf16.msra.mxu3 %v61_v14 }
  0x18   :  { %75 = vmatpush.bf16.msra.mxu0 %v60_v17  ;;  %662 = vmatpush.bf16.msra.mxu1 %v60_v17 }
  0x19   :  { %663 = vmatpush.bf16.msra.mxu2 %v60_v17  ;;  %664 = vmatpush.bf16.msra.mxu3 %v60_v17 }
  0x1c   :  { %76 = vmatpush.bf16.msra.mxu0 %v59_v20  ;;  %665 = vmatpush.bf16.msra.mxu1 %v59_v20 }
  0x1d   :  { %666 = vmatpush.bf16.msra.mxu2 %v59_v20  ;;  %667 = vmatpush.bf16.msra.mxu3 %v59_v20 }
  0x20   :  { %77 = vmatpush.bf16.msra.mxu0 %v58_v25  ;;  %668 = vmatpush.bf16.msra.mxu1 %v58_v25 }
  0x21   :  { %669 = vmatpush.bf16.msra.mxu2 %v58_v25  ;;  %670 = vmatpush.bf16.msra.mxu3 %v58_v25 }
  0x23   :  { %78 = vmatmul.bf16.vlgmr.msra.gmra.mxu0 %v34_v32  ;;  %88 = vmatmul.bf16.vlgmr.msra.gmra.mxu1 %v36_v33 }
  0x24   :  { %98 = vmatmul.bf16.vlgmr.msra.gmra.mxu2 %v38_v34  ;;  %108 = vmatmul.bf16.vlgmr.msra.gmra.mxu3 %v40_v35 }
  0x33   :  { %83 = vmatmul.bf16.gmra.mxu0 %v35_v44  ;;  %93 = vmatmul.bf16.gmra.mxu1 %v37_v45 }
  0x34   :  { %103 = vmatmul.bf16.gmra.mxu2 %v39_v46  ;;  %113 = vmatmul.bf16.gmra.mxu3 %v41_v47 }
  0xa0   :  { %v79_v49 = vpop.f32.mrf.mxu0  ;;  %v89_v50 = vpop.f32.mrf.mxu1 }
  0xa1   :  { %v80_v51 = vadd.f32 %v971_v48, %v79_v49  ;;  %v90_v52 = vadd.f32 %v971_v48, %v89_v50 }
  0xa3   :  { %676 = vtanh.f32 %v80_v51 }
  0xa4   :  { %678 = vtanh.f32 %v90_v52 }
  0xa7   :  { %v99_v54 = vpop.f32.mrf.mxu2  ;;  %v109_v55 = vpop.f32.mrf.mxu3 }
  0xa8   :  { %v100_v56 = vadd.f32 %v971_v48, %v99_v54  ;;  %v110_v57 = vadd.f32 %v971_v48, %v109_v55  ;;  %v81_v58 = vpop.f32.mrf.mxu0  ;;  %v91_v59 = vpop.f32.mrf.mxu1 }
  0xa9   :  { %v677_v60 = vpop.eup %676  ;;  %v92_v62 = vadd.f32 %v971_v48, %v91_v59  ;;  %v82_v0 = vadd.f32 %v971_v48, %v81_v58 }
  0xaa   :  { %v679_v61 = vpop.eup %678  ;;  %680 = vtanh.f32 %v100_v56  ;;  %v139_v63 = vmul.f32 %v677_v60, %v978_v53 }
  0xab   :  { %682 = vtanh.f32 %v110_v57  ;;  %v143_v1 = vmul.f32 %v679_v61, %v978_v53 }
  0xac   :  { %v156_v2 = vsel %vm155_vm0, %v139_v63, 0.0  ;;  %684 = vtanh.f32 %v92_v62 }
  0xad   :  { %v168_v3 = vsel %vm155_vm0, %v143_v1, 0.0  ;;  %157 = vadd.xlane.f32.xlu0 %v156_v2  ;;  %686 = vtanh.f32 %v82_v0 }
  0xae   :  { %169 = vadd.xlane.f32.xlu2 %v168_v3 }
  0xaf   :  { %v101_v4 = vpop.f32.mrf.mxu2  ;;  %v111_v5 = vpop.f32.mrf.mxu3 }
  0xb0   :  { %v681_v6 = vpop.eup %680  ;;  %v112_v7 = vadd.f32 %v971_v48, %v111_v5  ;;  %v84_v8 = vpop.f32.mrf.mxu0  ;;  %v102_v14 = vadd.f32 %v971_v48, %v101_v4 }
  0xb1   :  { %v94_v9 = vpop.f32.mrf.mxu1  ;;  %v683_v10 = vpop.eup %682  ;;  %v85_v11 = vadd.f32 %v971_v48, %v84_v8  ;;  %v147_v13 = vmul.f32 %v681_v6, %v978_v53 }
  0xb2   :  { %v95_v12 = vadd.f32 %v971_v48, %v94_v9  ;;  %v151_v15 = vmul.f32 %v683_v10, %v978_v53  ;;  %688 = vtanh.f32 %v112_v7  ;;  %v685_v17 = vpop.eup %684 }
  0xb3   :  { %v180_v16 = vsel %vm155_vm0, %v147_v13, 0.0  ;;  %690 = vtanh.f32 %v85_v11  ;;  %v687_v19 = vpop.eup %686  ;;  %v144_v22 = vmul.f32 %v685_v17, %v978_v53 }
  0xb4   :  { %181 = vadd.xlane.f32.xlu1 %v180_v16  ;;  %v192_v18 = vsel %vm155_vm0, %v151_v15, 0.0  ;;  %692 = vtanh.f32 %v95_v12  ;;  %v140_v32 = vmul.f32 %v687_v19, %v978_v53 }
  0xb5   :  { %193 = vadd.xlane.f32.xlu0 %v192_v18  ;;  %694 = vtanh.f32 %v102_v14  ;;  %v171_v46 = vsel %vm155_vm0, %v144_v22, 0.0 }
  0xb6   :  { %v159_v50 = vsel %vm155_vm0, %v140_v32, 0.0 }
  0xb7   :  { %v104_v20 = vpop.f32.mrf.mxu2  ;;  %v114_v21 = vpop.f32.mrf.mxu3 }
  0xb8   :  { %v86_v25 = vpop.f32.mrf.mxu0  ;;  %v689_v33 = vpop.eup %688  ;;  %v105_v35 = vadd.f32 %v971_v48, %v104_v20  ;;  %v115_v60 = vadd.f32 %v971_v48, %v114_v21 }
  0xb9   :  { %v691_v34 = vpop.eup %690  ;;  %v152_v43 = vmul.f32 %v689_v33, %v978_v53  ;;  %v87_v45 = vadd.f32 %v971_v48, %v86_v25  ;;  %v96_v51 = vpop.f32.mrf.mxu1 }
  0xba   :  { %v693_v44 = vpop.eup %692  ;;  %696 = vtanh.f32 %v105_v35  ;;  %v141_v52 = vmul.f32 %v691_v34, %v978_v53  ;;  %v97_v59 = vadd.f32 %v971_v48, %v96_v51 }
  0xbb   :  { %v695_v47 = vpop.eup %694  ;;  %v195_v49 = vsel %vm155_vm0, %v152_v43, 0.0  ;;  %v145_v54 = vmul.f32 %v693_v44, %v978_v53  ;;  %698 = vtanh.f32 %v87_v45 }
  0xbc   :  { %172 = vadd.xlane.f32.xlu1 %v171_v46  ;;  %196 = vadd.xlane.f32.xlu2 %v195_v49  ;;  %v148_v56 = vmul.f32 %v695_v47, %v978_v53  ;;  %v162_v61 = vsel %vm155_vm0, %v141_v52, 0.0 }
  0xbd   :  { %160 = vadd.xlane.f32.xlu0 %v159_v50  ;;  %v174_v62 = vsel %vm155_vm0, %v145_v54, 0.0 }
  0xbe   :  { %v183_v0 = vsel %vm155_vm0, %v148_v56, 0.0 }
  0xbf   :  { %v106_v55 = vpop.f32.mrf.mxu2  ;;  %v116_v58 = vpop.f32.mrf.mxu3 }
  0xc0   :  { %v107_v57 = vadd.f32 %v971_v48, %v106_v55  ;;  %v117_v63 = vadd.f32 %v971_v48, %v116_v58  ;;  %v697_v1 = vpop.eup %696 }
  0xc1   :  { %v699_v2 = vpop.eup %698  ;;  %v149_v4 = vmul.f32 %v697_v1, %v978_v53 }
  0xc2   :  { %700 = vtanh.f32 %v107_v57  ;;  %v142_v5 = vmul.f32 %v699_v2, %v978_v53 }
  0xc3   :  { %702 = vtanh.f32 %v97_v59  ;;  %v186_v9 = vsel %vm155_vm0, %v149_v4, 0.0 }
  0xc4   :  { %184 = vadd.xlane.f32.xlu1 %v183_v0  ;;  %163 = vadd.xlane.f32.xlu2 %v162_v61  ;;  %704 = vtanh.f32 %v115_v60  ;;  %v165_v10 = vsel %vm155_vm0, %v142_v5, 0.0 }
  0xc5   :  { %175 = vadd.xlane.f32.xlu0 %v174_v62  ;;  %706 = vtanh.f32 %v117_v63 }
  0xc8   :  { %v701_v3 = vpop.eup %700 }
  0xc9   :  { %v150_v6 = vmul.f32 %v701_v3, %v978_v53  ;;  %v703_v7 = vpop.eup %702 }
  0xca   :  { %v705_v8 = vpop.eup %704  ;;  %v146_v13 = vmul.f32 %v703_v7, %v978_v53 }
  0xcb   :  { %v189_v48 = vsel %vm155_vm0, %v150_v6, 0.0  ;;  %v707_v11 = vpop.eup %706  ;;  %v153_v12 = vmul.f32 %v705_v8, %v978_v53 }
  0xcc   :  { %190 = vadd.xlane.f32.xlu1 %v189_v48  ;;  %187 = vadd.xlane.f32.xlu2 %v186_v9  ;;  %v154_v14 = vmul.f32 %v707_v11, %v978_v53  ;;  %v177_v16 = vsel %vm155_vm0, %v146_v13, 0.0 }
  0xcd   :  { %166 = vadd.xlane.f32.xlu0 %v165_v10  ;;  %v198_v15 = vsel %vm155_vm0, %v153_v12, 0.0 }
  0xce   :  { %v201_v17 = vsel %vm155_vm0, %v154_v14, 0.0 }
  0xd4   :  { %199 = vadd.xlane.f32.xlu1 %v198_v15  ;;  %178 = vadd.xlane.f32.xlu2 %v177_v16 }
  0xd5   :  { %202 = vadd.xlane.f32.xlu0 %v201_v17 }
 0x120   :  { %v158_v18 = vpop.xlane.xlu0 %157 }
 0x121   :  { %v170_v19 = vpop.xlane.xlu2 %169  ;;  %v204_v20 = vrot.slane %v158_v18, 4 }
 0x122   :  { %v228_v21 = vrot.slane %v170_v19, 4 }
 0x123   :  { %v205_v22 = vmax.f32 %v158_v18, %v204_v20 }
 0x124   :  { %v229_v25 = vmax.f32 %v170_v19, %v228_v21 }
 0x125   :  { %v206_v32 = vrot.slane %v205_v22, 2 }
 0x126   :  { %v230_v33 = vrot.slane %v229_v25, 2 }
 0x127   :  { %v207_v34 = vmax.f32 %v205_v22, %v206_v32  ;;  %v182_v35 = vpop.xlane.xlu1 %181 }
 0x128   :  { %v231_v53 = vmax.f32 %v229_v25, %v230_v33  ;;  %v252_v43 = vrot.slane %v182_v35, 4  ;;  %v194_v44 = vpop.xlane.xlu0 %193 }
 0x129   :  { %v208_v45 = vrot.slane %v207_v34, 1  ;;  %v276_v46 = vrot.slane %v194_v44, 4 }
 0x12a   :  { %v232_v47 = vrot.slane %v231_v53, 1  ;;  %v253_v49 = vmax.f32 %v182_v35, %v252_v43 }
 0x12b   :  { %v209_v50 = vmax.f32 %v207_v34, %v208_v45  ;;  %v277_v51 = vmax.f32 %v194_v44, %v276_v46 }
 0x12c   :  { %v233_v52 = vmax.f32 %v231_v53, %v232_v47  ;;  %v254_v54 = vrot.slane %v253_v49, 2 }
 0x12d   :  { %v300_v55 = vsub.f32 %v158_v18, %v209_v50  ;;  %v278_v56 = vrot.slane %v277_v51, 2 }
 0x12e   :  { %v304_v57 = vsub.f32 %v170_v19, %v233_v52  ;;  %v255_v58 = vmax.f32 %v253_v49, %v254_v54 }
 0x12f   :  { %v316_v59 = vmul.f32 1.442695, %v300_v55  ;;  %v279_v60 = vmax.f32 %v277_v51, %v278_v56  ;;  %v1026_v61 = vpop.xlane.xlu1 %172  ;;  %v1029_v1 = vpop.xlane.xlu2 %196 }
 0x130   :  { %v324_v62 = vmul.f32 1.442695, %v304_v57  ;;  %v256_v63 = vrot.slane %v255_v58, 1  ;;  %v234_v0 = vrot.slane %v1026_v61, 4  ;;  %v1031_v2 = vpop.xlane.xlu0 %160  ;;  %v282_v4 = vrot.slane %v1029_v1, 4 }
 0x131   :  { %708 = vpow2.f32 %v316_v59  ;;  %v280_v3 = vrot.slane %v279_v60, 1  ;;  %v210_v5 = vrot.slane %v1031_v2, 4 }
 0x132   :  { %710 = vpow2.f32 %v324_v62  ;;  %v257_v6 = vmax.f32 %v255_v58, %v256_v63  ;;  %v235_v7 = vmax.f32 %v1026_v61, %v234_v0  ;;  %v283_v8 = vmax.f32 %v1029_v1, %v282_v4 }
 0x133   :  { %v281_v48 = vmax.f32 %v279_v60, %v280_v3  ;;  %v211_v9 = vmax.f32 %v1031_v2, %v210_v5 }
 0x134   :  { %v308_v10 = vsub.f32 %v182_v35, %v257_v6  ;;  %v236_v11 = vrot.slane %v235_v7, 2  ;;  %v284_v13 = vrot.slane %v283_v8, 2 }
 0x135   :  { %v312_v12 = vsub.f32 %v194_v44, %v281_v48  ;;  %v212_v14 = vrot.slane %v211_v9, 2 }
 0x136   :  { %v332_v15 = vmul.f32 1.442695, %v308_v10  ;;  %v237_v16 = vmax.f32 %v235_v7, %v236_v11  ;;  %v285_v22 = vmax.f32 %v283_v8, %v284_v13 }
 0x137   :  { %v709_v17 = vpop.eup %708  ;;  %v340_v18 = vmul.f32 1.442695, %v312_v12  ;;  %v213_v19 = vmax.f32 %v211_v9, %v212_v14  ;;  %v1040_v45 = vpop.xlane.xlu1 %184 }
 0x138   :  { %v711_v20 = vpop.eup %710  ;;  %v348_v21 = vrot.slane %v709_v17, 4  ;;  %712 = vpow2.f32 %v332_v15  ;;  %v444_v25 = vmul.f32 %v709_v17, %v878_v23  ;;  %v238_v34 = vrot.slane %v237_v16, 1  ;;  %v1049_v10 = vpop.xlane.xlu2 %163 }
 0x139   :  { %714 = vpow2.f32 %v340_v18  ;;  %v372_v32 = vrot.slane %v711_v20, 4  ;;  %v214_v35 = vrot.slane %v213_v19, 1  ;;  %v448_v53 = vmul.f32 %v711_v20, %v888_v26  ;;  %v1051_v15 = vpop.xlane.xlu0 %175 }
 0x13a   :  { %v349_v33 = vadd.f32 %v709_v17, %v348_v21  ;;  %v286_v44 = vrot.slane %v285_v22, 1  ;;  %v460_v46 = vrot.slane %v444_v25, 4  ;;  %v239_v50 = vmax.f32 %v237_v16, %v238_v34 }
 0x13b   :  { %v373_v49 = vadd.f32 %v711_v20, %v372_v32  ;;  %v215_v51 = vmax.f32 %v213_v19, %v214_v35  ;;  %v484_v54 = vrot.slane %v448_v53, 4  ;;  %v258_v56 = vrot.slane %v1040_v45, 4 }
 0x13c   :  { %v350_v43 = vrot.slane %v349_v33, 2  ;;  %v287_v58 = vmax.f32 %v285_v22, %v286_v44  ;;  %v461_v59 = vadd.f32 %v460_v46, %v444_v25  ;;  %v305_v63 = vsub.f32 %v1026_v61, %v239_v50 }
 0x13d   :  { %v301_v0 = vsub.f32 %v1031_v2, %v215_v51  ;;  %v374_v3 = vrot.slane %v373_v49, 2  ;;  %v485_v4 = vadd.f32 %v484_v54, %v448_v53  ;;  %v259_v6 = vmax.f32 %v1040_v45, %v258_v56 }
 0x13e   :  { %v713_v47 = vpop.eup %712  ;;  %v351_v55 = vadd.f32 %v350_v43, %v349_v33  ;;  %v462_v48 = vrot.slane %v461_v59, 2  ;;  %v216_v18 = vrot.slane %v1049_v10, 4  ;;  %v240_v32 = vrot.slane %v1051_v15, 4 }
 0x13f   :  { %v715_v52 = vpop.eup %714  ;;  %v452_v23 = vmul.f32 %v713_v47, %v898_v28  ;;  %v396_v57 = vrot.slane %v713_v47, 4  ;;  %v313_v28 = vsub.f32 %v1029_v1, %v287_v58  ;;  %v318_v12 = vmul.f32 1.442695, %v301_v0  ;;  %v1056_v43 = vpop.xlane.xlu1 %190 }
 0x140   :  { %v420_v26 = vrot.slane %v715_v52, 4  ;;  %v456_v60 = vmul.f32 %v715_v52, %v908_v30  ;;  %v352_v5 = vrot.slane %v351_v55, 1  ;;  %v326_v30 = vmul.f32 1.442695, %v305_v63 }
 0x141   :  { %v508_v62 = vrot.slane %v452_v23, 4  ;;  %v397_v7 = vadd.f32 %v713_v47, %v396_v57  ;;  %v375_v13 = vadd.f32 %v374_v3, %v373_v49  ;;  %v486_v61 = vrot.slane %v485_v4, 2 }
 0x142   :  { %v421_v8 = vadd.f32 %v715_v52, %v420_v26  ;;  %v532_v9 = vrot.slane %v456_v60, 4  ;;  %v353_v14 = vadd.f32 %v352_v5, %v351_v55  ;;  %v260_v2 = vrot.slane %v259_v6, 2 }
 0x143   :  { %v509_v11 = vadd.f32 %v508_v62, %v452_v23  ;;  %v398_v16 = vrot.slane %v397_v7, 2  ;;  %v342_v17 = vmul.f32 1.442695, %v313_v28  ;;  %716 = vpow2.f32 %v318_v12 }
 0x144   :  { %v463_v1 = vadd.f32 %v462_v48, %v461_v59  ;;  %v422_v19 = vrot.slane %v421_v8, 2  ;;  %v533_v20 = vadd.f32 %v532_v9, %v456_v60  ;;  %v261_v21 = vmax.f32 %v259_v6, %v260_v2 }
 0x145   :  { %v510_v22 = vrot.slane %v509_v11, 2  ;;  %718 = vpow2.f32 %v326_v30  ;;  %v217_v25 = vmax.f32 %v1049_v10, %v216_v18  ;;  %v376_v33 = vrot.slane %v375_v13, 1 }
 0x146   :  { %720 = vrcp.f32 %v353_v14  ;;  %v262_v34 = vrot.slane %v261_v21, 1  ;;  %v399_v35 = vadd.f32 %v398_v16, %v397_v7  ;;  %v1058_v44 = vadd.f32 %v486_v61, %v485_v4  ;;  %v1066_v4 = vpop.xlane.xlu2 %187 }
 0x147   :  { %722 = vpow2.f32 %v342_v17  ;;  %v218_v53 = vrot.slane %v217_v25, 2  ;;  %v423_v46 = vadd.f32 %v422_v19, %v421_v8  ;;  %v534_v47 = vrot.slane %v533_v20, 2 }
 0x148   :  { %v263_v49 = vmax.f32 %v261_v21, %v262_v34  ;;  %v464_v51 = vrot.slane %v463_v1, 1  ;;  %v511_v52 = vadd.f32 %v510_v22, %v509_v11  ;;  %v241_v55 = vmax.f32 %v1051_v15, %v240_v32 }
 0x149   :  { %v717_v50 = vpop.eup %716  ;;  %v219_v54 = vmax.f32 %v217_v25, %v218_v53  ;;  %v377_v23 = vadd.f32 %v376_v33, %v375_v13  ;;  %v270_v57 = vrot.slane %v1056_v43, 4  ;;  %v400_v59 = vrot.slane %v399_v35, 1  ;;  %v1080_v25 = vpop.xlane.xlu0 %166 }
 0x14a   :  { %v354_v56 = vrot.slane %v717_v50, 4  ;;  %v309_v26 = vsub.f32 %v1040_v45, %v263_v49  ;;  %v488_v63 = vrot.slane %v1058_v44, 1  ;;  %v424_v0 = vrot.slane %v423_v46, 1 }
 0x14b   :  { %v719_v58 = vpop.eup %718  ;;  %v220_v60 = vrot.slane %v219_v54, 1  ;;  %v1064_v3 = vadd.f32 %v534_v47, %v533_v20  ;;  %v465_v6 = vadd.f32 %v464_v51, %v463_v1  ;;  %v512_v7 = vrot.slane %v511_v52, 1  ;;  %v1090_v51 = vpop.xlane.xlu1 %199 }
 0x14c   :  { %v721_v62 = vpop.eup %720  ;;  %v334_v28 = vmul.f32 1.442695, %v309_v26  ;;  %v242_v48 = vrot.slane %v241_v55, 2  ;;  %724 = vrcp.f32 %v377_v23  ;;  %v378_v8 = vrot.slane %v719_v58, 4 }
 0x14d   :  { %v723_v5 = vpop.eup %722  ;;  %v355_v9 = vadd.f32 %v717_v50, %v354_v56  ;;  %v271_v11 = vmax.f32 %v1056_v43, %v270_v57  ;;  %v401_v45 = vadd.f32 %v400_v59, %v399_v35  ;;  %v221_v30 = vmax.f32 %v219_v54, %v220_v60 }
 0x14e   :  { %726 = vpow2.f32 %v334_v28  ;;  %v264_v12 = vrot.slane %v1066_v4, 4  ;;  %v1070_v13 = vmul.f32 %v721_v62, %v465_v6  ;;  %v425_v61 = vadd.f32 %v424_v0, %v423_v46  ;;  %v1092_v56 = vpop.xlane.xlu2 %178 }
 0x14f   :  { %v536_v14 = vrot.slane %v1064_v3, 1  ;;  %v426_v2 = vrot.slane %v723_v5, 4  ;;  %v1073_v16 = vadd.f32 %v512_v7, %v511_v52  ;;  %v1076_v17 = vmul.f32 %v719_v58, %v893_v27 }
 0x150   :  { %v302_v18 = vsub.f32 %v1049_v10, %v221_v30  ;;  %v243_v1 = vmax.f32 %v241_v55, %v242_v48  ;;  %v379_v19 = vadd.f32 %v719_v58, %v378_v8  ;;  %v356_v20 = vrot.slane %v355_v9, 2 }
 0x151   :  { %v445_v21 = vmul.f32 %v717_v50, %v883_v24  ;;  %v272_v22 = vrot.slane %v271_v11, 2  ;;  %728 = vrcp.f32 %v401_v45  ;;  %v265_v34 = vmax.f32 %v1066_v4, %v264_v12 }
 0x152   :  { %v320_v32 = vmul.f32 1.442695, %v302_v18  ;;  %v244_v33 = vrot.slane %v243_v1, 1  ;;  %v1083_v35 = vpop.eup %724  ;;  %730 = vrcp.f32 %v425_v61  ;;  %v427_v27 = vadd.f32 %v723_v5, %v426_v2 }
 0x153   :  { %v1086_v53 = vmul.f32 %v723_v5, %v913_v31  ;;  %v273_v10 = vmax.f32 %v271_v11, %v272_v22  ;;  %v490_v47 = vrot.slane %v1076_v17, 4  ;;  %v266_v49 = vrot.slane %v265_v34, 2 }
 0x154   :  { %v727_v46 = vpop.eup %726  ;;  %v245_v24 = vmax.f32 %v243_v1, %v244_v33  ;;  %v222_v50 = vrot.slane %v1080_v25, 4  ;;  %v380_v52 = vrot.slane %v379_v19, 2  ;;  %v357_v54 = vadd.f32 %v356_v20, %v355_v9 }
 0x155   :  { %v466_v55 = vrot.slane %v445_v21, 4  ;;  %v402_v23 = vrot.slane %v727_v46, 4  ;;  %732 = vpow2.f32 %v320_v32  ;;  %v274_v57 = vrot.slane %v273_v10, 1 }
 0x156   :  { %v306_v31 = vsub.f32 %v1051_v15, %v245_v24  ;;  %v267_v58 = vmax.f32 %v265_v34, %v266_v49  ;;  %v428_v59 = vrot.slane %v427_v27, 2  ;;  %v453_v26 = vmul.f32 %v727_v46, %v903_v29 }
 0x157   :  { %v223_v60 = vmax.f32 %v1080_v25, %v222_v50  ;;  %v288_v62 = vrot.slane %v1090_v51, 4  ;;  %v729_v0 = vpop.eup %728  ;;  %v275_v6 = vmax.f32 %v273_v10, %v274_v57  ;;  %v246_v28 = vrot.slane %v1092_v56, 4 }
 0x158   :  { %v328_v5 = vmul.f32 1.442695, %v306_v31  ;;  %v268_v7 = vrot.slane %v267_v58, 1  ;;  %v1099_v48 = vpop.eup %730  ;;  %v358_v8 = vrot.slane %v357_v54, 1  ;;  %v467_v9 = vadd.f32 %v466_v55, %v445_v21 }
 0x159   :  { %v224_v15 = vrot.slane %v223_v60, 2  ;;  %v289_v11 = vmax.f32 %v1090_v51, %v288_v62  ;;  %v381_v45 = vadd.f32 %v380_v52, %v379_v19  ;;  %v403_v30 = vadd.f32 %v727_v46, %v402_v23 }
 0x15a   :  { %v311_v29 = vsub.f32 %v1056_v43, %v275_v6  ;;  %v269_v12 = vmax.f32 %v267_v58, %v268_v7  ;;  %734 = vpow2.f32 %v328_v5  ;;  %v247_v18 = vmax.f32 %v1092_v56, %v246_v28 }
 0x15b   :  { %v225_v61 = vmax.f32 %v223_v60, %v224_v15  ;;  %v290_v2 = vrot.slane %v289_v11, 2  ;;  %v733_v1 = vpop.eup %732  ;;  %v538_v20 = vrot.slane %v1086_v53, 4  ;;  %v514_v22 = vrot.slane %v453_v26, 4 }
 0x15c   :  { %v338_v32 = vmul.f32 1.442695, %v311_v29  ;;  %v310_v21 = vsub.f32 %v1066_v4, %v269_v12  ;;  %v429_v33 = vadd.f32 %v428_v59, %v427_v27  ;;  %v359_v34 = vadd.f32 %v358_v8, %v357_v54  ;;  %v1116_v29 = vpop.xlane.xlu0 %202 }
 0x15d   :  { %v468_v10 = vrot.slane %v467_v9, 2  ;;  %v360_v19 = vrot.slane %v733_v1, 4  ;;  %v226_v43 = vrot.slane %v225_v61, 1  ;;  %v291_v24 = vmax.f32 %v289_v11, %v290_v2 }
 0x15e   :  { %736 = vpow2.f32 %v338_v32  ;;  %v336_v46 = vmul.f32 1.442695, %v310_v21  ;;  %v382_v49 = vrot.slane %v381_v45, 1  ;;  %v491_v50 = vadd.f32 %v490_v47, %v1076_v17 }
 0x15f   :  { %v404_v52 = vrot.slane %v403_v30, 2  ;;  %v248_v55 = vrot.slane %v247_v18, 2  ;;  %v515_v23 = vadd.f32 %v514_v22, %v453_v26  ;;  %v227_v31 = vmax.f32 %v225_v61, %v226_v43 }
 0x160   :  { %738 = vpow2.f32 %v336_v46  ;;  %v292_v57 = vrot.slane %v291_v24, 1  ;;  %v735_v58 = vpop.eup %734  ;;  %v1108_v4 = vmul.f32 %v729_v0, %v1073_v16  ;;  %v430_v27 = vrot.slane %v429_v33, 1 }
 0x161   :  { %v469_v54 = vadd.f32 %v468_v10, %v467_v9  ;;  %v361_v59 = vadd.f32 %v733_v1, %v360_v19  ;;  %v1111_v60 = vadd.f32 %v538_v20, %v1086_v53  ;;  %740 = vrcp.f32 %v359_v34 }
 0x162   :  { %v303_v62 = vsub.f32 %v1080_v25, %v227_v31  ;;  %v293_v17 = vmax.f32 %v291_v24, %v292_v57  ;;  %v383_v47 = vadd.f32 %v382_v49, %v381_v45  ;;  %v405_v5 = vadd.f32 %v404_v52, %v403_v30 }
 0x163   :  { %v446_v26 = vmul.f32 %v733_v1, %v926_v36  ;;  %v249_v6 = vmax.f32 %v247_v18, %v248_v55  ;;  %v516_v28 = vrot.slane %v515_v23, 2  ;;  %v384_v8 = vrot.slane %v735_v58, 4 }
 0x164   :  { %v737_v7 = vpop.eup %736  ;;  %v322_v16 = vmul.f32 1.442695, %v303_v62  ;;  %v314_v0 = vsub.f32 %v1090_v51, %v293_v17  ;;  %v492_v9 = vrot.slane %v491_v50, 2  ;;  %v431_v15 = vadd.f32 %v430_v27, %v429_v33 }
 0x165   :  { %v470_v11 = vrot.slane %v469_v54, 1  ;;  %v362_v53 = vrot.slane %v361_v59, 2  ;;  %v540_v25 = vrot.slane %v1111_v60, 2  ;;  %v414_v45 = vrot.slane %v737_v7, 4 }
 0x166   :  { %v739_v12 = vpop.eup %738  ;;  %742 = vpow2.f32 %v322_v16  ;;  %v344_v30 = vmul.f32 1.442695, %v314_v0  ;;  %v406_v36 = vrot.slane %v405_v5, 1  ;;  %v472_v61 = vrot.slane %v446_v26, 4 }
 0x167   :  { %744 = vrcp.f32 %v383_v47  ;;  %v250_v2 = vrot.slane %v249_v6, 1  ;;  %v741_v18 = vpop.eup %740  ;;  %v517_v1 = vadd.f32 %v516_v28, %v515_v23  ;;  %v385_v20 = vadd.f32 %v735_v58, %v384_v8 }
 0x168   :  { %v408_v51 = vrot.slane %v739_v12, 4  ;;  %v294_v22 = vrot.slane %v1116_v29, 4  ;;  %v1120_v32 = vadd.f32 %v492_v9, %v491_v50  ;;  %746 = vrcp.f32 %v431_v15 }
 0x169   :  { %v471_v21 = vadd.f32 %v470_v11, %v469_v54  ;;  %v363_v33 = vadd.f32 %v362_v53, %v361_v59  ;;  %v415_v34 = vadd.f32 %v737_v7, %v414_v45  ;;  %v454_v19 = vmul.f32 %v739_v12, %v946_v40 }
 0x16a   :  { %v409_v10 = vadd.f32 %v739_v12, %v408_v51  ;;  %748 = vpow2.f32 %v344_v30  ;;  %v407_v43 = vadd.f32 %v406_v36, %v405_v5  ;;  %v473_v24 = vadd.f32 %v472_v61, %v446_v26 }
 0x16b   :  { %v1123_v46 = vmul.f32 %v741_v18, %v471_v21  ;;  %v251_v49 = vmax.f32 %v249_v6, %v250_v2  ;;  %v518_v55 = vrot.slane %v517_v1, 1  ;;  %v386_v23 = vrot.slane %v385_v20, 2 }
 0x16c   :  { %v743_v52 = vpop.eup %742  ;;  %v450_v31 = vmul.f32 %v735_v58, %v936_v38  ;;  %v295_v50 = vmax.f32 %v1116_v29, %v294_v22  ;;  %v364_v27 = vrot.slane %v363_v33, 1  ;;  %v455_v54 = vmul.f32 %v737_v7, %v951_v41 }
 0x16d   :  { %v1127_v57 = vpop.eup %744  ;;  %v366_v59 = vrot.slane %v743_v52, 4  ;;  %v447_v40 = vmul.f32 %v743_v52, %v931_v37  ;;  %v416_v62 = vrot.slane %v415_v34, 2  ;;  %v410_v17 = vrot.slane %v409_v10, 2 }
 0x16e   :  { %v520_v47 = vrot.slane %v454_v19, 4  ;;  %v307_v5 = vsub.f32 %v1092_v56, %v251_v49  ;;  %v1132_v26 = vpop.eup %746  ;;  %750 = vrcp.f32 %v407_v43  ;;  %v474_v6 = vrot.slane %v473_v24, 2 }
 0x16f   :  { %v367_v38 = vadd.f32 %v743_v52, %v366_v59  ;;  %v478_v58 = vrot.slane %v447_v40, 4  ;;  %v387_v8 = vadd.f32 %v386_v23, %v385_v20  ;;  %v496_v16 = vrot.slane %v450_v31, 4 }
 0x170   :  { %v749_v28 = vpop.eup %748  ;;  %v330_v0 = vmul.f32 1.442695, %v307_v5  ;;  %v296_v9 = vrot.slane %v295_v50, 2  ;;  %v365_v41 = vadd.f32 %v364_v27, %v363_v33  ;;  %v526_v7 = vrot.slane %v455_v54, 4 }
 0x171   :  { %v368_v15 = vrot.slane %v367_v38, 2  ;;  %v479_v37 = vadd.f32 %v478_v58, %v447_v40  ;;  %v417_v11 = vadd.f32 %v416_v62, %v415_v34  ;;  %v411_v53 = vadd.f32 %v410_v17, %v409_v10 }
 0x172   :  { %v521_v12 = vadd.f32 %v520_v47, %v454_v19  ;;  %v432_v45 = vrot.slane %v749_v28, 4  ;;  %752 = vpow2.f32 %v330_v0  ;;  %v297_v36 = vmax.f32 %v295_v50, %v296_v9 }
 0x173   :  { %v369_v56 = vadd.f32 %v368_v15, %v367_v38  ;;  %v480_v30 = vrot.slane %v479_v37, 2  ;;  %v519_v61 = vadd.f32 %v518_v55, %v517_v1  ;;  %v475_v2 = vadd.f32 %v474_v6, %v473_v24 }
 0x174   :  { %v388_v18 = vrot.slane %v387_v8, 1  ;;  %v497_v51 = vadd.f32 %v496_v16, %v450_v31  ;;  %v751_v20 = vpop.eup %750  ;;  %v433_v21 = vadd.f32 %v749_v28, %v432_v45  ;;  %v458_v33 = vmul.f32 %v749_v28, %v956_v42 }
 0x175   :  { %v370_v22 = vrot.slane %v369_v56, 1  ;;  %v298_v43 = vrot.slane %v297_v36, 1  ;;  %754 = vrcp.f32 %v365_v41  ;;  %v418_v49 = vrot.slane %v417_v11, 1 }
 0x176   :  { %v527_v34 = vadd.f32 %v526_v7, %v455_v54  ;;  %v412_v10 = vrot.slane %v411_v53, 1  ;;  %v522_v19 = vrot.slane %v521_v12, 2  ;;  %v481_v23 = vadd.f32 %v480_v30, %v479_v37 }
 0x177   :  { %v371_v52 = vadd.f32 %v370_v22, %v369_v56  ;;  %v299_v27 = vmax.f32 %v297_v36, %v298_v43  ;;  %v1135_v59 = vmul.f32 %v751_v20, %v519_v61  ;;  %v476_v1 = vrot.slane %v475_v2, 1 }
 0x178   :  { %v389_v24 = vadd.f32 %v388_v18, %v387_v8  ;;  %v498_v55 = vrot.slane %v497_v51, 2  ;;  %v753_v31 = vpop.eup %752  ;;  %v434_v50 = vrot.slane %v433_v21, 2  ;;  %v544_v40 = vrot.slane %v458_v33, 4 }
 0x179   :  { %756 = vrcp.f32 %v371_v52  ;;  %v315_v42 = vsub.f32 %v1116_v29, %v299_v27  ;;  %v528_v62 = vrot.slane %v527_v34, 2  ;;  %v413_v17 = vadd.f32 %v412_v10, %v411_v53 }
 0x17a   :  { %v390_v47 = vrot.slane %v753_v31, 4  ;;  %v451_v54 = vmul.f32 %v753_v31, %v941_v39  ;;  %v419_v5 = vadd.f32 %v418_v49, %v417_v11  ;;  %v523_v6 = vadd.f32 %v522_v19, %v521_v12  ;;  %v772_v19 = vld [vmem:[%s1178_s0 + $0x78] sm:$0xff]  ;;  %s799_s0 = smov [#allocation2]  }
 0x17b   :  { %v482_v38 = vrot.slane %v481_v23, 1  ;;  %v346_v58 = vmul.f32 1.442695, %v315_v42  ;;  %v755_v28 = vpop.eup %754  ;;  %v477_v16 = vadd.f32 %v476_v1, %v475_v2  ;;  %758 = vrcp.f32 %v389_v24  ;;  %s633_s29 = sshll.u32 %s799_s0, 4  ;;  %s634_s29 = int_to_ptr.vmem [resolvable:$true] %s633_s29 }
 0x17c   :  { %v391_v8 = vadd.f32 %v753_v31, %v390_v47  ;;  %v502_v0 = vrot.slane %v451_v54, 4  ;;  %v435_v9 = vadd.f32 %v434_v50, %v433_v21  ;;  %v545_v41 = vadd.f32 %v544_v40, %v458_v33 }
 0x17d   :  { %760 = vpow2.f32 %v346_v58  ;;  %v489_v29 = vadd.f32 %v488_v63, %v1058_v44  ;;  %v529_v7 = vadd.f32 %v528_v62, %v527_v34  ;;  %v524_v11 = vrot.slane %v523_v6, 1 }
 0x17e   :  { %762 = vrcp.f32 %v413_v17  ;;  %v392_v15 = vrot.slane %v391_v8, 2  ;;  %v503_v39 = vadd.f32 %v502_v0, %v451_v54  ;;  %v483_v53 = vadd.f32 %v482_v38, %v481_v23 }
 0x17f   :  { %v757_v37 = vpop.eup %756  ;;  %764 = vrcp.f32 %v419_v5  ;;  %v499_v12 = vadd.f32 %v498_v55, %v497_v51  ;;  %v574_v30 = vmul.f32 %v755_v28, %v477_v16  ;;  %v436_v36 = vrot.slane %v435_v9, 1 }
 0x180   :  { %v393_v45 = vadd.f32 %v392_v15, %v391_v8  ;;  %v504_v56 = vrot.slane %v503_v39, 2  ;;  %v546_v61 = vrot.slane %v545_v41, 2  ;;  %v575_v2 = vmul.f32 %v757_v37, %v483_v53 }
 0x181   :  { %v759_v18 = vpop.eup %758  ;;  %v530_v20 = vrot.slane %v529_v7, 1  ;;  %v494_v63 = vrot.slane %v1120_v32, 1  ;;  %v525_v21 = vadd.f32 %v524_v11, %v523_v6  ;;  %v500_v33 = vrot.slane %v499_v12, 1 }
 0x182   :  { %v394_v44 = vrot.slane %v393_v45, 1  ;;  %v505_v43 = vadd.f32 %v504_v56, %v503_v39  ;;  %v605_v51 = vsel %vm604_vm1, %v1123_v46, %v1070_v13  ;;  %v437_v1 = vadd.f32 %v436_v36, %v435_v9 }
 0x183   :  { %v761_v22 = vpop.eup %760  ;;  %v607_v23 = vsel %vm606_vm2, %v574_v30, %v605_v51  ;;  %v547_v24 = vadd.f32 %v546_v61, %v545_v41  ;;  %v576_v13 = vmul.f32 %v1083_v35, %v489_v29  ;;  %v531_v46 = vadd.f32 %v530_v20, %v529_v7 }
 0x184   :  { %v763_v49 = vpop.eup %762  ;;  %v395_v34 = vadd.f32 %v394_v44, %v393_v45  ;;  %v438_v10 = vrot.slane %v761_v22, 4  ;;  %v459_v52 = vmul.f32 %v772_v19, %v761_v22  ;;  %v609_v55 = vsel %vm608_vm3, %v575_v2, %v607_v23 }
 0x185   :  { %v765_v27 = vpop.eup %764  ;;  %v495_v40 = vadd.f32 %v494_v63, %v1120_v32  ;;  %v506_v42 = vrot.slane %v505_v43, 1  ;;  %v582_v62 = vmul.f32 %v763_v49, %v525_v21  ;;  %v611_v54 = vsel %vm610_vm4, %v576_v13, %v609_v55 }
 0x186   :  { %766 = vrcp.f32 %v395_v34  ;;  %v439_v31 = vadd.f32 %v761_v22, %v438_v10  ;;  %v550_v50 = vrot.slane %v459_v52, 4  ;;  %v541_v5 = vadd.f32 %v540_v25, %v1111_v60 }
 0x187   :  { %768 = vrcp.f32 %v437_v1  ;;  %v501_v6 = vadd.f32 %v500_v33, %v499_v12  ;;  %v577_v38 = vmul.f32 %v1127_v57, %v495_v40  ;;  %v548_v35 = vrot.slane %v547_v24, 1 }
 0x188   :  { %v440_v17 = vrot.slane %v439_v31, 2  ;;  %v551_v47 = vadd.f32 %v550_v50, %v459_v52  ;;  %v583_v16 = vmul.f32 %v765_v27, %v531_v46  ;;  %v507_v32 = vadd.f32 %v506_v42, %v505_v43 }
 0x189   :  { %v613_v8 = vsel %vm612_vm5, %v577_v38, %v611_v54  ;;  %v618_v0 = vsel %vm604_vm1, %v1135_v59, %v1108_v4  ;;  %v578_v29 = vmul.f32 %v759_v18, %v501_v6  ;;  %v542_v25 = vrot.slane %v541_v5, 1 }
 0x18a   :  { %v441_v58 = vadd.f32 %v440_v17, %v439_v31  ;;  %v552_v28 = vrot.slane %v551_v47, 2  ;;  %v619_v60 = vsel %vm606_vm2, %v582_v62, %v618_v0  ;;  %v537_v39 = vadd.f32 %v536_v14, %v1064_v3 }
 0x18b   :  { %v615_v37 = vsel %vm614_vm6, %v578_v29, %v613_v8  ;;  %v620_v4 = vsel %vm608_vm3, %v583_v16, %v619_v60  ;;  %v549_v59 = vadd.f32 %v548_v35, %v547_v24  ;;  %v543_v45 = vadd.f32 %v542_v25, %v541_v5 }
 0x18c   :  { %v767_v9 = vpop.eup %766  ;;  %v442_v41 = vrot.slane %v441_v58, 1  ;;  %v553_v57 = vadd.f32 %v552_v28, %v551_v47  ;;  %v584_v12 = vmul.f32 %v1099_v48, %v537_v39 }
 0x18d   :  { %v579_v7 = vmul.f32 %v767_v9, %v507_v32  ;;  %v769_v11 = vpop.eup %768  ;;  %v585_v61 = vmul.f32 %v1132_v26, %v543_v45 }
 0x18e   :  { %v443_v15 = vadd.f32 %v442_v41, %v441_v58  ;;  %v554_v56 = vrot.slane %v553_v57, 1  ;;  %v586_v30 = vmul.f32 %v769_v11, %v549_v59  ;;  %v621_v36 = vsel %vm610_vm4, %v584_v12, %v620_v4 }
 0x18f   :  { %v617_v53 = vsel %vm616_vm7, %v579_v7, %v615_v37  ;;  %v622_v14 = vsel %vm612_vm5, %v585_v61, %v621_v36 }
 0x190   :  { %770 = vrcp.f32 %v443_v15  ;;  %627 = vst [vmem:[#allocation2] sm:$0xff] %v617_v53  ;;  %v555_v3 = vadd.f32 %v554_v56, %v553_v57  ;;  %v623_v48 = vsel %vm614_vm6, %v586_v30, %v622_v14 }
 0x196   :  { %v771_v2 = vpop.eup %770 }
 0x197   :  { %v587_v18 = vmul.f32 %v771_v2, %v555_v3 }
 0x199   :  { %v624_v20 = vsel %vm616_vm7, %v587_v18, %v623_v48 }
 0x19a   :  { %628 = vst [vmem:[#allocation2 + $0x8] sm:$0xff] %v624_v20 }
 0x19b   :  { %641 = dma.vmem_to_hbm [thread:$0]  %s634_s29, 256, %s636_s6, [#allocation3], %s800_s7, %s800_s7, %s801_s8  }
 0x19c   :  { %797 = dma.done.wait [#allocation3], 256  }
 0x19d   :  { %798 = vsyncadd [#allocation3], 4294967040 }
 0x19e   :  { %646 = vsyncpa [#allocation3], 1 }

</bundles_post_ra>
